<compile_context>
chip_gen: v5e
topology: v5e:2x2
jax: 0.10.0
libtpu: 0.0.40
codegen_flags: <defaults>
</compile_context>

<pallas_src>
import jax
import jax.numpy as jnp
from jax.experimental import pallas as pl
from jax.experimental.pallas import tpu as pltpu


_SEG_TARGET_BYTES = 4 << 20   # per-source-rank contiguous DMA segment target
_MAX_FOLD = 128               # cap on statically unrolled source-rank adds
_MIN_GRID_STEPS = 8           # keep both v7x TensorCores fed + pipeline overlap


def _vmem_budget_bytes():
    """(vmem_limit_bytes to request, byte budget resident blocks may use)."""
    try:
        cap = int(pltpu.get_tpu_info().vmem_capacity_bytes)
    except Exception:
        cap = 64 << 20                       # assume the tightest chip (v7x)
    # Request a generous scoped-VMEM limit, but don't hog 128-MiB parts
    # (v5e/v6e): the HBM roofline flattens once per-step segments reach a few
    # MiB, so more block bytes buys nothing and starves surrounding fusions.
    limit = min((cap * 3) // 4, 64 << 20)    # 48 MiB on v7x, 64 MiB on v5e/v6e
    # The per-element accounting below already counts both double buffers, so
    # only keep a fixed margin for Mosaic-internal scratch.
    budget = limit - (4 << 20)
    return limit, budget


def _aligned_divisors(n, quantum):
    out = set()
    d = 1
    while d * d <= n:
        if n % d == 0:
            for c in (d, n // d):
                if c % quantum == 0:
                    out.add(c)
        d += 1
    return sorted(out)


def _choose_tile(n, cap, quantum, par_factor, min_steps=_MIN_GRID_STEPS):
    """Largest legal row tile for an axis of length n.

    Legal = divisor of n that is a multiple of `quantum` (sublane pack), or
    the full extent n.  Prefers the largest tile that still yields at least
    `min_steps` grid steps overall (par_factor * n_tiles) so both v7x
    TensorCores get work and the pipeline has overlap.  Returns None if
    nothing fits `cap`.
    """
    cands = [t for t in _aligned_divisors(n, quantum) if t <= cap]
    if not cands:
        return n if n <= cap else None       # full-extent tile is always legal
    good = [t for t in cands if par_factor * (n // t) >= min_steps]
    return max(good) if good else min(cands)


def _acc_dtype(dtype):
    return jnp.float32 if jnp.issubdtype(dtype, jnp.floating) else jnp.int32


def _reduce_scatter_folded_kernel(x_ref, o_ref):
    """All source ranks folded into one block.

    x_ref : (W, 1, bt, C)    o_ref : (1, bt, C)

    Running accumulation (static unroll) keeps a single (bt, C) wide-precision
    tile live instead of materializing a (W, bt, C) upcast temporary.
    """
    acc_dt = _acc_dtype(x_ref.dtype)
    acc = x_ref[0].astype(acc_dt)
    for w in range(1, x_ref.shape[0]):
        acc = acc + x_ref[w].astype(acc_dt)
    o_ref[...] = acc.astype(o_ref.dtype)


def _reduce_scatter_chunked_kernel(x_ref, o_ref, acc_ref):
    """Large-W fallback: Wc source ranks folded per block, grid-reduced over
    W // Wc chunks (last grid axis, 'arbitrary').  Wide-precision VMEM scratch
    accumulator, copy-init at chunk 0, single down-cast store at the end.

    x_ref : (Wc, 1, bt, C)   o_ref : (1, bt, C)   acc_ref : (1, bt, C)
    """
    acc_dt = acc_ref.dtype
    part = x_ref[0].astype(acc_dt)
    for w in range(1, x_ref.shape[0]):
        part = part + x_ref[w].astype(acc_dt)

    p = pl.program_id(2)

    @pl.when(p == 0)
    def _():
        acc_ref[...] = part

    @pl.when(p > 0)
    def _():
        acc_ref[...] = acc_ref[...] + part

    @pl.when(p == pl.num_programs(2) - 1)
    def _():
        o_ref[...] = acc_ref[...].astype(o_ref.dtype)


def pooled_embeddings_reduce_scatter(x: jax.Array, *, max_fold: int = _MAX_FOLD) -> jax.Array:
    """Forward of PooledEmbeddingsReduceScatter (equal-split base path).

    x : [W, W*B, D] -- rank-major stack of every rank's local pooled
                       embeddings [num_buckets * batch, dim].
    returns [W, B, D] with out[r] = sum_p x[p, r*B:(r+1)*B, :].
    """
    W, WB, D = x.shape
    assert WB % W == 0, "num_buckets*batch must be divisible by world size"
    B = WB // W
    F = B * D
    in_b = x.dtype.itemsize
    pack = 8 * max(1, 4 // in_b)            # min sublane tile: 8 f32/16 bf16/32 i8
    acc_b = 4                               # f32 / int32 accumulator

    limit, budget = _vmem_budget_bytes()
    seg_elems = max(1, _SEG_TARGET_BYTES // in_b)

    # Bytes of VMEM per resident tile element: double-buffered input segments,
    # double-buffered output, running accumulator + one upcast temp, plus the
    # scratch accumulator on the chunked path.
    def bytes_per_elem(wc, chunked):
        return 2 * wc * in_b + 2 * in_b + 2 * acc_b + (acc_b if chunked else 0)

    # --- fold width: how many source ranks go into one block ----------------
    min_tile_elems = pack * 128
    wc = 1
    for c in _aligned_divisors(W, 1):       # divisors of W
        if c <= max_fold and min_tile_elems * bytes_per_elem(c, c < W) <= budget:
            wc = max(wc, c)
    chunked = wc < W
    max_tile_elems = max(min_tile_elems,
                         min(seg_elems, budget // bytes_per_elem(wc, chunked)))

    # --- layout: present the kernel a (W, W, R, C) view, lane dim C ---------
    # Preference: lane-dense (C a multiple of 128) first, then the no-copy
    # masked-store row layout, then a zero-padded flat layout as last resort.
    candidates = []
    if D % 128 == 0:
        candidates.append((B, D, 0))                       # row, lane-dense
        candidates.append((F // 128, 128, 0))              # flat fallback
    else:
        if F % 128 == 0:
            candidates.append((F // 128, 128, 0))          # flat, lane-dense
        candidates.append((B, D, 0))                       # row, masked stores
    f_pad = -(-F // (128 * pack)) * (128 * pack)
    candidates.append((f_pad // 128, 128, f_pad - F))      # padded flat

    R = C = bt = None
    pad = 0
    for r_cand, c_cand, pad_cand in candidates:
        cap_rows = min(r_cand, max_tile_elems // c_cand)
        t = _choose_tile(r_cand, cap_rows, pack, W) if cap_rows >= 1 else None
        if t is not None:
            R, C, pad, bt = r_cand, c_cand, pad_cand, t
            break
    assert bt is not None, "no legal tiling found"
    n_bt = R // bt

    if pad == 0 and C == D:
        x_view = x.reshape(W, W, B, D)
    else:
        x3 = x.reshape(W, W, F)
        if pad:
            x3 = jnp.pad(x3, ((0, 0), (0, 0), (0, pad)))
        x_view = x3.reshape(W, W, R, C)

    cost = pl.CostEstimate(flops=(W - 1) * W * B * D,
                           transcendentals=0,
                           bytes_accessed=(W + 1) * W * B * D * in_b)

    if not chunked:
        out = pl.pallas_call(
            _reduce_scatter_folded_kernel,
            out_shape=jax.ShapeDtypeStruct((W, R, C), x.dtype),
            grid_spec=pltpu.PrefetchScalarGridSpec(
                num_scalar_prefetch=0,
                grid=(W, n_bt),  # (dest rank r, row tile i) -- both parallel
                in_specs=[pl.BlockSpec((W, 1, bt, C), lambda r, i: (0, r, i, 0))],
                out_specs=pl.BlockSpec((1, bt, C), lambda r, i: (r, i, 0)),
            ),
            compiler_params=pltpu.CompilerParams(
                dimension_semantics=("parallel", "parallel"),
                vmem_limit_bytes=limit,
            ),
            cost_estimate=cost,
        )(x_view)
    else:
        out = pl.pallas_call(
            _reduce_scatter_chunked_kernel,
            out_shape=jax.ShapeDtypeStruct((W, R, C), x.dtype),
            grid_spec=pltpu.PrefetchScalarGridSpec(
                num_scalar_prefetch=0,
                grid=(W, n_bt, W // wc),  # (dest rank, row tile, rank chunk)
                in_specs=[pl.BlockSpec((wc, 1, bt, C),
                                       lambda r, i, p: (p, r, i, 0))],
                out_specs=pl.BlockSpec((1, bt, C), lambda r, i, p: (r, i, 0)),
                scratch_shapes=[pltpu.VMEM((1, bt, C), _acc_dtype(x.dtype))],
            ),
            compiler_params=pltpu.CompilerParams(
                dimension_semantics=("parallel", "parallel", "arbitrary"),
                vmem_limit_bytes=limit,
            ),
            cost_estimate=cost,
        )(x_view)

    if pad == 0 and C == D:
        return out
    return out.reshape(W, R * C)[:, :F].reshape(W, B, D)


if __name__ == "__main__":
    key = jax.random.PRNGKey(0)
    k1, k2, k3 = jax.random.split(key, 3)

    def _ref(x):
        W, WB, D = x.shape
        B = WB // W
        acc = jnp.sum(x.reshape(W, W, B, D).astype(jnp.float32), axis=0)
        return acc.astype(x.dtype)

    # 1) Main path: folded W-way reduction, lane-dense row layout (f32).
    W, B, D = 2, 8, 128
    x1 = jax.random.normal(k1, (W, W * B, D), dtype=jnp.float32)
    out1 = jax.block_until_ready(pooled_embeddings_reduce_scatter(x1))
    assert out1.shape == (W, B, D)
    assert jnp.allclose(out1, _ref(x1), atol=1e-5, rtol=1e-5)

    # 2) Flat lane-dense layout when D is not a multiple of 128 (bf16).
    W, B, D = 2, 16, 96
    x2 = jax.random.normal(k2, (W, W * B, D), dtype=jnp.bfloat16)
    out2 = jax.block_until_ready(pooled_embeddings_reduce_scatter(x2))
    assert out2.shape == (W, B, D)
    assert jnp.allclose(out2.astype(jnp.float32), _ref(x2).astype(jnp.float32),
                        atol=2e-2, rtol=2e-2)

    # 3) Chunked large-W fallback (forced small fold width).
    W, B, D = 4, 8, 128
    x3 = jax.random.normal(k3, (W, W * B, D), dtype=jnp.float32)
    out3 = jax.block_until_ready(pooled_embeddings_reduce_scatter(x3, max_fold=2))
    assert out3.shape == (W, B, D)
    assert jnp.allclose(out3, _ref(x3), atol=1e-5, rtol=1e-5)

    print("KERNEL_OK")
</pallas_src>

<mosaic_0001>
module attributes {stable_mosaic.version = 11 : i64} {
  func.func @_reduce_scatter_folded_kernel(%arg0: i32, %arg1: i32, %arg2: memref<2x1x8x128xf32, #tpu.memory_space<vmem>>, %arg3: memref<1x8x128xf32, #tpu.memory_space<vmem>>) attributes {dimension_semantics = [#tpu.dimension_semantics<parallel>, #tpu.dimension_semantics<parallel>], iteration_bounds = array<i64: 2, 1>, scalar_prefetch = 0 : i64, scratch_operands = 0 : i64, tpu.core_type = #tpu.core_type<tc>, window_params = [{transform_indices = @transform_0, window_bounds = array<i64: 2, 1, 8, 128>}, {transform_indices = @transform_1, window_bounds = array<i64: 1, 8, 128>}]} {
    %c0 = arith.constant 0 : index
    %c0_0 = arith.constant 0 : index
    %c0_1 = arith.constant 0 : index
    %c0_2 = arith.constant 0 : index
    %0 = vector.load %arg2[%c0, %c0_0, %c0_1, %c0_2] : memref<2x1x8x128xf32, #tpu.memory_space<vmem>>, vector<1x1x8x128xf32>
    %1 = vector.shape_cast %0 : vector<1x1x8x128xf32> to vector<1x8x128xf32>
    %c1 = arith.constant 1 : index
    %c0_3 = arith.constant 0 : index
    %c0_4 = arith.constant 0 : index
    %c0_5 = arith.constant 0 : index
    %2 = vector.load %arg2[%c1, %c0_3, %c0_4, %c0_5] : memref<2x1x8x128xf32, #tpu.memory_space<vmem>>, vector<1x1x8x128xf32>
    %3 = vector.shape_cast %2 : vector<1x1x8x128xf32> to vector<1x8x128xf32>
    %4 = arith.addf %1, %3 : vector<1x8x128xf32>
    %c0_6 = arith.constant 0 : index
    %c0_7 = arith.constant 0 : index
    %c0_8 = arith.constant 0 : index
    %5 = vector.load %arg3[%c0_6, %c0_7, %c0_8] : memref<1x8x128xf32, #tpu.memory_space<vmem>>, vector<1x8x128xf32>
    tpu.vector_store %arg3[%c0_6, %c0_7, %c0_8], %4 {strides = array<i32>} : memref<1x8x128xf32, #tpu.memory_space<vmem>>, vector<1x8x128xf32>,
    return
  }
  func.func @transform_0(%arg0: i32, %arg1: i32) -> (i32, i32, i32, i32) {
    %c0_i32 = arith.constant 0 : i32
    %c0_i32_0 = arith.constant 0 : i32
    %c0_i32_1 = arith.constant 0 : i32
    return %c0_i32, %arg0, %arg1, %c0_i32_0 : i32, i32, i32, i32
  }
  func.func @transform_1(%arg0: i32, %arg1: i32) -> (i32, i32, i32) {
    %c0_i32 = arith.constant 0 : i32
    %c0_i32_0 = arith.constant 0 : i32
    return %arg0, %arg1, %c0_i32 : i32, i32, i32
  }
}

</mosaic_0001>

<bundles_post_ra>
// kernel: tpu_custom_call.1
= control target key start
LH: loop header
LB: loop body
LE: loop exit
PB: predicated region body
PF: predicated region fallthrough
CT: control target
= control target key end

     0   :  { %6 = vsyncpa [#allocation3], 0  ;;  %s582_s0 = inlined_call_operand.hbm [shape: f32[2,2,8,128], index: 0, kind: input, shape index: {}]   ;;  %s583_s1 = inlined_call_operand.hbm [shape: f32[2,8,128], index: 1, kind: output, shape index: {}]  }
   0x1   :  { %8 = vsyncpa [#allocation3 + $0x1], 0 }
   0x2   :  { %9 = vsyncpa [#allocation4], 0 }
   0x3   :  { %11 = vsyncpa [#allocation4 + $0x1], 0  ;;  %s461_s6 = smov 0   ;;  %s463_s7 = smov 0  }
   0x4   :  { %s465_s8 = smov 0   ;;  %s467_s9 = smov 0  }
   0x5   :  { %s469_s10 = smov 0   ;;  %s471_s11 = smov 0  }
   0x6 LB: > { %s255_s12 = sadd.s32 4294967295, %s446_s11   ;;  %s256_s13 = sadd.s32 4294967294, %s446_s11   ;;  %s446_s11 = sphi %s471_s11, %s17_s11   ;;  %s442_s10 = sphi %s469_s10, %s592_s10   ;;  %s438_s9 = sphi %s467_s9, %s591_s9   ;;  %s434_s8 = sphi %s465_s8, %s590_s8   ;;  %s430_s7 = sphi %s463_s7, %s589_s7   ;;  %s426_s6 = sphi %s461_s6, %s588_s6  }
   0x7   : > { %s29_s14 = sadd.s32 1, %s442_s10  ;;  %s38_s15 = sadd.s32 1, %s434_s8 }
   0x8   : > { %p31_p0 = scmp.ge.s32.totalorder %s29_s14, 2  ;;  %p45_p1 = scmp.ne.s32.totalorder %s434_s8, %s430_s7 }
   0x9   : > { %p46_p2 = scmp.eq.s32.totalorder %s446_s11, 0  ;;  %p51_p3 = scmp.ne.s32.totalorder %s430_s7, %s426_s6 }
   0xa   : > { %s594_s14 = smov (%p31_p0, %s29_s14), 0  ;;  %p52_p5 = scmp.eq.s32.totalorder %s255_s12, 0 }
   0xb   : > { %p502_p4 = por %p46_p2, %p45_p1  ;;  %s33_s17 = ssub.s32 %s442_s10, %s594_s14 }
   0xc   : > { %p77_p6 = scmp.eq.s32.totalorder %s255_s12, 1  ;;  %p36_p7 = scmp.eq.s32.totalorder %s33_s17, 0 }
   0xd   : > { %p508_p8 = por %p52_p5, %p51_p3  ;;  %p83_p10 = scmp.eq.s32.totalorder %s256_s13, 1 }
   0xe   : > { %p512_p9 = por %p77_p6, %p45_p1  ;;  %p258_p12 = scmp.ge.s32.totalorder %s446_s11, 2 }
   0xf   : > { %s517_s20 = scalar_select %p36_p7, %s434_s8, %s38_s15  }
  0x10   : > { %p519_p11 = por %p83_p10, %p51_p3  ;;  %p281_p13 = scmp.lt.s32.totalorder %s446_s11, 2 }
  0x11   : > { %s103_s22 = sand.u32 1, %s434_s8   ;;  %s260_s24 = sshll.u32 %s442_s10, 3 }
  0x12   : > { %s259_s23 = sshll.u32 %s103_s22, 4  ;;  %s112_s27 = scalar_lea.hbm %s582_s0, %s260_s24 }
  0x13   : > { %s107_s28 = scalar_lea.vmem [#allocation2], %s259_s23  ;;  %s113_s30 = sshll.u32 %s112_s27, 4  ;;  %s114_s30 = int_to_ptr.hbm [resolvable:$true] %s113_s30 }
  0x14   : > { %s115_s29 = sshll.u32 %s107_s28, 4  ;;  %p274_p0 = pnand %p281_p13, %p502_p4  ;;  %s116_s29 = int_to_ptr.vmem [resolvable:$true] %s115_s29 }
  0x15   : > { %s104_s2 = scalar_lea.sflag [#allocation3], %s103_s22  ;;  %s448_s3 = smov 256  }
  0x16   : > { %s449_s4 = smov 128   ;;  %s450_s5 = smov 8  }
  0x17   : > { %276 = dma.hbm_to_vmem [thread:$0]  (!%p274_p0), %s114_s30, 256, %s116_s29, %s104_s2, %s448_s3, %s449_s4, %s450_s5  }
  0x18   : > { %p261_p1 = scmp.ge.s32.totalorder %s446_s11, 1  ;;  %p123_p2 = scmp.lt.s32.totalorder %s446_s11, 3 }
  0x1a   : > { %p124_p3 = pnand %p261_p1, %p123_p2 }
  0x1b   : > { %s535_s12 = sand.u32 (!%p124_p3), 1, %s430_s7  }
  0x1c   : > { %127 = sbr.rel (%p124_p3) target bundleno = 49 (0x31), region = 24  ;;  %s262_s13 = sshll.u32 (!%p124_p3), %s535_s12, 4 }
  0x1d   : > { %s130_s15 = scalar_lea.sflag (!%p124_p3), [#allocation3], %s535_s12  ;;  %s133_s17 = scalar_lea.vmem (!%p124_p3), [#allocation2], %s262_s13 }
  0x21   : > { %417 = dma.done.wait (%p508_p8), %s130_s15, 256  }
  0x22   : > { %419 = vsyncadd (%p508_p8), %s130_s15, 4294967040  ;;  %s263_s16 = sshll.u32 %s535_s12, 3  ;;  %s266_s22 = sshll.u32 %s438_s9, 3  ;;  %v153_v0 = vld [vmem:[%s133_s17] sm:$0xff]  ;;  %v264_v1 = vld [vmem:[%s133_s17 + $0x8] sm:$0xff] }
  0x23   : > { %s170_s25 = scalar_lea.hbm %s583_s1, %s266_s22  ;;  %s152_s26 = scalar_lea.vmem [#allocation5], %s263_s16  ;;  %v156_v2 = vadd.f32 %v264_v1, %v153_v0 }
  0x24   : > { %s172_s27 = sshll.u32 %s152_s26, 4  ;;  %s174_s28 = sshll.u32 %s170_s25, 4  ;;  %s173_s27 = int_to_ptr.vmem [resolvable:$true] %s172_s27  ;;  %s175_s28 = int_to_ptr.hbm [resolvable:$true] %s174_s28 }
  0x25   : > { %157 = vst [vmem:[%s152_s26] sm:$0xff] %v156_v2  ;;  %s159_s18 = scalar_lea.sflag [#allocation4], %s535_s12  ;;  %s378_s29 = sshra.s32 %s175_s28, 4  ;;  %s379_s29 = int_to_ptr.hbm [resolvable:$true] %s378_s29 }
  0x26   : > { %s380_s30 = scalar_lea.hbm %s379_s29, 8  ;;  %s384_s3 = scalar_lea.hbm %s583_s1, 16 }
  0x27   : > { %p381_p4 = scmp.ne.s32.totalorder %s379_s29, %s380_s30  ;;  %p385_p7 = scmp.lt.s32.totalorder %s379_s29, %s583_s1 }
  0x28   : > { %p386_p8 = scmp.lt.s32.totalorder %s384_s3, %s380_s30 }
  0x29   : > { %p382_p5 = pnand %p381_p4, %p512_p9 }
  0x2a   : > { %p387_p10 = por %p386_p8, %p385_p7 }
  0x2b   : > { %p383_p6 = pneg %p382_p5 }
  0x2d   : > { %p388_p13 = pnand %p387_p10, %p383_p6 }
  0x2f   : > { %391 = shalt.err (!%p388_p13)
}
  0x30   : > { %271 = dma.vmem_to_hbm [thread:$0]  (%p512_p9), %s173_s27, 128, %s175_s28, %s159_s18  }
  0x31 PF: > { %s186_s12 = sand.u32 1, %s426_s6   ;;  %p278_p0 = pnand %p258_p12, %p519_p11 }
  0x32   : > { %s187_s13 = scalar_lea.sflag [#allocation4], %s186_s12 }
  0x33   : > { %p279_p1 = pneg %p278_p0 }
  0x35   : > { %421 = dma.done.wait (%p279_p1), %s187_s13, 128  }
  0x36   : > { %423 = vsyncadd (%p279_p1), %s187_s13, 4294967168  ;;  %s17_s11 = sadd.s32 1, %s446_s11   ;;  %s588_s6 = smov %s430_s7 }
  0x37   : > { %p14_p2 = scmp.ge.s32.totalorder %s17_s11, 4   ;;  %s589_s7 = smov %s434_s8 }
  0x38   : > { %s590_s8 = smov %s517_s20  ;;  %s591_s9 = smov %s442_s10 }
  0x39   : > { %s592_s10 = smov %s594_s14  ;;  %16 = sbr.rel (!%p14_p2) target bundleno = 6 (0x6), region = 70 }
  0x3e   :  { %193 = vsyncpa [#allocation3], 1 }
  0x3f   :  { %195 = vsyncpa [#allocation3 + $0x1], 1 }
  0x40   :  { %196 = vsyncpa [#allocation4], 1 }
  0x41   :  { %198 = vsyncpa [#allocation4 + $0x1], 1 }

</bundles_post_ra>
